<compile_context>
chip_gen: v6e
topology: v6e:2x2x1
jax: 0.10.0
libtpu: 0.0.40
codegen_flags: <defaults>
</compile_context>

<pallas_src>
import jax
import jax.numpy as jnp
from jax.experimental import pallas as pl
from jax.experimental.pallas import tpu as pltpu

_LANE = 128


def _make_temporal_block_kernel(Nb, L, K, dilation, cp, compute_dtype):
    """Kernel body with static geometry baked in.

    Block layout is 2-D: rows = (batch_tile * time), lanes = channels.
    """
    M = Nb * L

    def kernel(xc_ref, w1_ref, b1_ref, w2_ref, out_ref):
        # xc_ref : (M, K*C_in)   im2col'd conv1 input rows (taps folded in wrapper)
        # w1_ref : (K*C_in, Cp)  conv1 weights, tap-major rows, lane-padded C_out
        # b1_ref : (1, Cp)       conv1 bias (f32, lane-padded)
        # w2_ref : (K, Cp, Cp)   conv2 weights per tap (no bias), lane/channel-padded
        # out_ref: (M, Cp)       lane-dense (128-wide) output rows
        #
        # Time index of each row within its own sequence (rows are (batch, time));
        # used to zero rows whose causal shift would cross a sequence boundary.
        t_in_seq = jax.lax.broadcasted_iota(jnp.int32, (M, 1), 0) % L

        # ---- conv1: single im2col matmul + bias + ReLU (dropout = id, eval) ----
        h = jnp.dot(xc_ref[...], w1_ref[...],
                    preferred_element_type=jnp.float32)           # (M, Cp) f32 acc
        h = jnp.maximum(h + b1_ref[...], 0.0)                     # f32 ReLU

        # ---- conv2: dilated causal conv, K per-tap matmuls + ReLU, no bias ----
        o = None
        for k in range(K):
            s = (K - 1 - k) * dilation                            # causal shift of tap k
            if s == 0:
                hk = h
            else:
                # Shift rows DOWN by s (static sublane rotate on the XLU) and zero
                # rows whose shift crosses a sequence boundary (causal left-pad).
                rolled = pltpu.roll(h, shift=s, axis=0)
                hk = jnp.where(t_in_seq >= s, rolled, 0.0)
            d = jnp.dot(hk.astype(compute_dtype), w2_ref[k],
                        preferred_element_type=jnp.float32)       # (M, Cp) f32 acc
            o = d if o is None else o + d
        out_ref[...] = jnp.maximum(o, 0.0).astype(out_ref.dtype)

    return kernel


def temporal_block_forward(x_ncw, w1_oik, b1, w2_oik, *, kernel_size, dilation,
                           stride=1, compute_dtype=jnp.float32, batch_tile=8):
    """Forward pass matching TemporalBlock.forward (eval mode).

    x_ncw  : (N, C_in, L)      -- PyTorch NCW layout
    w1_oik : (C_out, C_in, K)  -- PyTorch Conv1d weight layout
    b1     : (C_out,)
    w2_oik : (C_out, C_out, K)
    returns: (N, C_out, L) float32
    compute_dtype: dtype fed to the MXU (use jnp.bfloat16 on v6e/v7x);
                   accumulation and elementwise math stay float32.
    """
    assert stride == 1, "TODO(synk): stride != 1 not implemented"
    N, c_in, L = x_ncw.shape
    c_out = w1_oik.shape[0]
    K = kernel_size
    pad = (K - 1) * dilation
    cp = -(-c_out // _LANE) * _LANE           # lane-dense (128-padded) out channels

    Nb = min(batch_tile, N)                   # batch elements folded per grid step
    n_tiles = -(-N // Nb)
    M = Nb * L                                # matmul M per grid step
    if n_tiles > 1 and M % 8 != 0:
        # sublane-tiling constraint: fall back to a single full-array block.
        Nb, n_tiles, M = N, 1, N * L
    Npad = n_tiles * Nb

    # ---- wrapper glue (tiny, plain JAX): layout + conv1 im2col + weight prep ----
    x_nlc = jnp.transpose(x_ncw, (0, 2, 1))                       # (N, L, C_in)
    if Npad != N:
        x_nlc = jnp.pad(x_nlc, ((0, Npad - N), (0, 0), (0, 0)))
    # Causal left-zero pad in time, then fold the K dilated taps into extra
    # channel columns (im2col) so conv1 is a single matmul inside the kernel.
    xp = jnp.pad(x_nlc, ((0, 0), (pad, 0), (0, 0)))               # (Npad, L+pad, C_in)
    x_cols = jnp.concatenate(
        [xp[:, k * dilation: k * dilation + L, :] for k in range(K)], axis=-1)
    x_cols = x_cols.reshape(Npad * L, K * c_in).astype(compute_dtype)

    # conv1 weights: (C_out, C_in, K) -> tap-major (K*C_in, Cp), lane-padded.
    w1_m = jnp.transpose(w1_oik, (2, 1, 0)).reshape(K * c_in, c_out)
    w1_m = jnp.pad(w1_m, ((0, 0), (0, cp - c_out))).astype(compute_dtype)
    # conv2 weights: (C_out, C_out, K) -> per-tap (K, Cp, Cp), channel/lane-padded.
    w2_m = jnp.transpose(w2_oik, (2, 1, 0))                       # (K, C_in2, C_out)
    w2_m = jnp.pad(w2_m, ((0, 0), (0, cp - c_out), (0, cp - c_out)))
    w2_m = w2_m.astype(compute_dtype)
    # conv1 bias stays f32 — it adds into the f32 accumulator.
    b1_m = jnp.pad(b1.reshape(1, c_out).astype(jnp.float32),
                   ((0, 0), (0, cp - c_out)))

    kernel = _make_temporal_block_kernel(Nb, L, K, dilation, cp, compute_dtype)

    out_rows = pl.pallas_call(
        kernel,
        out_shape=jax.ShapeDtypeStruct((Npad * L, cp), jnp.float32),
        grid_spec=pltpu.PrefetchScalarGridSpec(
            num_scalar_prefetch=0,
            grid=(n_tiles,),                                      # batch tiles
            in_specs=[
                pl.BlockSpec((M, K * c_in), lambda b: (b, 0)),     # im2col'd x rows
                pl.BlockSpec((K * c_in, cp), lambda b: (0, 0)),    # conv1 W (resident)
                pl.BlockSpec((1, cp), lambda b: (0, 0)),           # conv1 bias
                pl.BlockSpec((K, cp, cp), lambda b: (0, 0, 0)),    # conv2 W (resident)
            ],
            out_specs=pl.BlockSpec((M, cp), lambda b: (b, 0)),     # lane-dense output
        ),
        compiler_params=pltpu.CompilerParams(
            dimension_semantics=("parallel",)),                    # batch tiles independent
    )(x_cols, w1_m, b1_m, w2_m)

    out = out_rows.reshape(Npad, L, cp)[:N, :, :c_out]             # drop padding
    return jnp.transpose(out, (0, 2, 1))                           # back to (N, C_out, L)


def temporal_block_reference(x_ncw, w1_oik, b1, w2_oik, *, kernel_size, dilation):
    """Pure-JAX reference (same math as the PyTorch module in eval mode)."""
    pad = (kernel_size - 1) * dilation
    dn = ("NCH", "OIH", "NCH")

    xp = jnp.pad(x_ncw, ((0, 0), (0, 0), (pad, 0)))
    h = jax.lax.conv_general_dilated(
        xp, w1_oik, window_strides=(1,), padding="VALID",
        rhs_dilation=(dilation,), dimension_numbers=dn)
    h = jax.nn.relu(h + b1[None, :, None])

    hp = jnp.pad(h, ((0, 0), (0, 0), (pad, 0)))
    o = jax.lax.conv_general_dilated(
        hp, w2_oik, window_strides=(1,), padding="VALID",
        rhs_dilation=(dilation,), dimension_numbers=dn)
    return jax.nn.relu(o)


if __name__ == "__main__":
    # Module hyperparameters (small, consistent with TemporalBlock.__init__).
    n_inputs, n_outputs = 4, 8
    kernel_size, stride, dilation = 3, 1, 2
    N, L = 2, 16

    key = jax.random.PRNGKey(0)
    k_x, k_w1, k_b1, k_w2 = jax.random.split(key, 4)

    x = jax.random.normal(k_x, (N, n_inputs, L), dtype=jnp.float32)

    # Deterministic parameter init mirroring init_weights(): N(0, 0.01) weights.
    w1 = 0.01 * jax.random.normal(k_w1, (n_outputs, n_inputs, kernel_size), jnp.float32)
    b1 = 0.1 * jax.random.uniform(k_b1, (n_outputs,), jnp.float32, minval=-1.0, maxval=1.0)
    w2 = 0.01 * jax.random.normal(k_w2, (n_outputs, n_outputs, kernel_size), jnp.float32)

    ref = temporal_block_reference(x, w1, b1, w2,
                                   kernel_size=kernel_size, dilation=dilation)

    # f32 MXU inputs: tight check against the lax reference.
    out_f32 = temporal_block_forward(x, w1, b1, w2,
                                     kernel_size=kernel_size, dilation=dilation,
                                     stride=stride, compute_dtype=jnp.float32)
    out_f32 = jax.block_until_ready(out_f32)
    assert out_f32.shape == (N, n_outputs, L)
    assert jnp.allclose(out_f32, ref, atol=1e-4, rtol=1e-4), "f32 mismatch vs reference"

    # bf16 MXU inputs (recommended on v6e/v7x), f32 accumulation: loose check.
    out_bf16 = temporal_block_forward(x, w1, b1, w2,
                                      kernel_size=kernel_size, dilation=dilation,
                                      stride=stride, compute_dtype=jnp.bfloat16)
    out_bf16 = jax.block_until_ready(out_bf16)
    assert out_bf16.shape == (N, n_outputs, L)
    assert jnp.allclose(out_bf16, ref, atol=5e-3, rtol=5e-2), "bf16 mismatch vs reference"

    print("KERNEL_OK")
</pallas_src>

<mosaic_0001>
module attributes {stable_mosaic.version = 11 : i64} {
  func.func @kernel(%arg0: i32, %arg1: memref<32x12xf32, #tpu.memory_space<vmem>>, %arg2: memref<12x128xf32, #tpu.memory_space<vmem>>, %arg3: memref<1x128xf32, #tpu.memory_space<vmem>>, %arg4: memref<3x128x128xf32, #tpu.memory_space<vmem>>, %arg5: memref<32x128xf32, #tpu.memory_space<vmem>>) attributes {dimension_semantics = [#tpu.dimension_semantics<parallel>], iteration_bounds = array<i64: 1>, scalar_prefetch = 0 : i64, scratch_operands = 0 : i64, tpu.core_type = #tpu.core_type<tc>, window_params = [{transform_indices = @transform_0, window_bounds = array<i64: 32, 12>}, {pipeline_mode = #tpu.pipeline_mode<synchronous>, transform_indices = @transform_1, window_bounds = array<i64: 12, 128>}, {pipeline_mode = #tpu.pipeline_mode<synchronous>, transform_indices = @transform_2, window_bounds = array<i64: 1, 128>}, {pipeline_mode = #tpu.pipeline_mode<synchronous>, transform_indices = @transform_3, window_bounds = array<i64: 3, 128, 128>}, {transform_indices = @transform_4, window_bounds = array<i64: 32, 128>}]} {
    %0 = tpu.iota {dimensions = array<i32: 0>} : vector<32x1xi32>
    %c16_i32 = arith.constant 16 : i32
    %c0_i32 = arith.constant 0 : i32
    %1 = arith.cmpi eq, %c16_i32, %c0_i32 : i32
    %c1_i32 = arith.constant 1 : i32
    %2 = arith.select %1, %c1_i32, %c16_i32 : i32
    %3 = vector.broadcast %2 : i32 to vector<32x1xi32>
    %4 = arith.remsi %0, %3 : vector<32x1xi32>
    %c0_i32_0 = arith.constant 0 : i32
    %5 = vector.broadcast %c0_i32_0 : i32 to vector<32x1xi32>
    %6 = arith.cmpi ne, %4, %5 : vector<32x1xi32>
    %c0_i32_1 = arith.constant 0 : i32
    %7 = vector.broadcast %c0_i32_1 : i32 to vector<32x1xi32>
    %8 = arith.cmpi slt, %4, %7 : vector<32x1xi32>
    %c0_i32_2 = arith.constant 0 : i32
    %9 = arith.cmpi slt, %2, %c0_i32_2 : i32
    %10 = vector.broadcast %9 : i1 to vector<32x1xi1>
    %11 = vector.broadcast %10 : vector<32x1xi1> to vector<32x1xi1>
    %12 = arith.xori %8, %11 : vector<32x1xi1>
    %13 = arith.andi %12, %6 : vector<32x1xi1>
    %14 = vector.broadcast %2 : i32 to vector<32x1xi32>
    %15 = arith.addi %4, %14 : vector<32x1xi32>
    %16 = arith.select %13, %15, %4 : vector<32x1xi1>, vector<32x1xi32>
    %c0 = arith.constant 0 : index
    %c0_3 = arith.constant 0 : index
    %17 = vector.load %arg1[%c0, %c0_3] : memref<32x12xf32, #tpu.memory_space<vmem>>, vector<32x12xf32>
    %c0_4 = arith.constant 0 : index
    %c0_5 = arith.constant 0 : index
    %18 = vector.load %arg2[%c0_4, %c0_5] : memref<12x128xf32, #tpu.memory_space<vmem>>, vector<12x128xf32>
    %cst = arith.constant dense<0.000000e+00> : vector<32x128xf32>
    %19 = tpu.matmul %17, %18, %cst {dimension_numbers = #tpu.dot_dimension_numbers<[1], [0], [0], [1], [0, 0, 1, 1], [], []>} : vector<32x12xf32>, vector<12x128xf32>, vector<32x128xf32> -> vector<32x128xf32>
    %c0_6 = arith.constant 0 : index
    %c0_7 = arith.constant 0 : index
    %20 = vector.load %arg3[%c0_6, %c0_7] : memref<1x128xf32, #tpu.memory_space<vmem>>, vector<1x128xf32>
    %21 = vector.broadcast %20 : vector<1x128xf32> to vector<32x128xf32>
    %22 = arith.addf %19, %21 : vector<32x128xf32>
    %cst_8 = arith.constant 0.000000e+00 : f32
    %23 = vector.broadcast %cst_8 : f32 to vector<32x128xf32>
    %24 = arith.maximumf %22, %23 : vector<32x128xf32>
    %c4_i32 = arith.constant 4 : i32
    %25 = tpu.dynamic_rotate %24 by %c4_i32 dim 0 : vector<32x128xf32>, i32 -> vector<32x128xf32>
    %c4_i32_9 = arith.constant 4 : i32
    %26 = vector.broadcast %c4_i32_9 : i32 to vector<32x1xi32>
    %27 = arith.cmpi sge, %16, %26 : vector<32x1xi32>
    %cst_10 = arith.constant 0.000000e+00 : f32
    %28 = vector.shape_cast %27 : vector<32x1xi1> to vector<32x1xi1>
    %29 = vector.broadcast %28 : vector<32x1xi1> to vector<32x128xi1>
    %30 = vector.broadcast %cst_10 : f32 to vector<32x128xf32>
    %31 = arith.select %29, %25, %30 : vector<32x128xi1>, vector<32x128xf32>
    %c0_11 = arith.constant 0 : index
    %c0_12 = arith.constant 0 : index
    %c0_13 = arith.constant 0 : index
    %32 = vector.load %arg4[%c0_11, %c0_12, %c0_13] : memref<3x128x128xf32, #tpu.memory_space<vmem>>, vector<1x128x128xf32>
    %33 = vector.shape_cast %32 : vector<1x128x128xf32> to vector<128x128xf32>
    %cst_14 = arith.constant dense<0.000000e+00> : vector<32x128xf32>
    %34 = tpu.matmul %31, %33, %cst_14 {dimension_numbers = #tpu.dot_dimension_numbers<[1], [0], [0], [1], [0, 0, 1, 1], [], []>} : vector<32x128xf32>, vector<128x128xf32>, vector<32x128xf32> -> vector<32x128xf32>
    %c2_i32 = arith.constant 2 : i32
    %35 = tpu.dynamic_rotate %24 by %c2_i32 dim 0 : vector<32x128xf32>, i32 -> vector<32x128xf32>
    %c2_i32_15 = arith.constant 2 : i32
    %36 = vector.broadcast %c2_i32_15 : i32 to vector<32x1xi32>
    %37 = arith.cmpi sge, %16, %36 : vector<32x1xi32>
    %cst_16 = arith.constant 0.000000e+00 : f32
    %38 = vector.shape_cast %37 : vector<32x1xi1> to vector<32x1xi1>
    %39 = vector.broadcast %38 : vector<32x1xi1> to vector<32x128xi1>
    %40 = vector.broadcast %cst_16 : f32 to vector<32x128xf32>
    %41 = arith.select %39, %35, %40 : vector<32x128xi1>, vector<32x128xf32>
    %c1 = arith.constant 1 : index
    %c0_17 = arith.constant 0 : index
    %c0_18 = arith.constant 0 : index
    %42 = vector.load %arg4[%c1, %c0_17, %c0_18] : memref<3x128x128xf32, #tpu.memory_space<vmem>>, vector<1x128x128xf32>
    %43 = vector.shape_cast %42 : vector<1x128x128xf32> to vector<128x128xf32>
    %cst_19 = arith.constant dense<0.000000e+00> : vector<32x128xf32>
    %44 = tpu.matmul %41, %43, %cst_19 {dimension_numbers = #tpu.dot_dimension_numbers<[1], [0], [0], [1], [0, 0, 1, 1], [], []>} : vector<32x128xf32>, vector<128x128xf32>, vector<32x128xf32> -> vector<32x128xf32>
    %45 = arith.addf %34, %44 : vector<32x128xf32>
    %c2 = arith.constant 2 : index
    %c0_20 = arith.constant 0 : index
    %c0_21 = arith.constant 0 : index
    %46 = vector.load %arg4[%c2, %c0_20, %c0_21] : memref<3x128x128xf32, #tpu.memory_space<vmem>>, vector<1x128x128xf32>
    %47 = vector.shape_cast %46 : vector<1x128x128xf32> to vector<128x128xf32>
    %cst_22 = arith.constant dense<0.000000e+00> : vector<32x128xf32>
    %48 = tpu.matmul %24, %47, %cst_22 {dimension_numbers = #tpu.dot_dimension_numbers<[1], [0], [0], [1], [0, 0, 1, 1], [], []>} : vector<32x128xf32>, vector<128x128xf32>, vector<32x128xf32> -> vector<32x128xf32>
    %49 = arith.addf %45, %48 : vector<32x128xf32>
    %cst_23 = arith.constant 0.000000e+00 : f32
    %50 = vector.broadcast %cst_23 : f32 to vector<32x128xf32>
    %51 = arith.maximumf %49, %50 : vector<32x128xf32>
    %c0_24 = arith.constant 0 : index
    %c0_25 = arith.constant 0 : index
    %52 = vector.load %arg5[%c0_24, %c0_25] : memref<32x128xf32, #tpu.memory_space<vmem>>, vector<32x128xf32>
    tpu.vector_store %arg5[%c0_24, %c0_25], %51 {strides = array<i32>} : memref<32x128xf32, #tpu.memory_space<vmem>>, vector<32x128xf32>,
    return
  }
  func.func @transform_0(%arg0: i32) -> (i32, i32) {
    %c0_i32 = arith.constant 0 : i32
    %c0_i32_0 = arith.constant 0 : i32
    return %arg0, %c0_i32 : i32, i32
  }
  func.func @transform_1(%arg0: i32) -> (i32, i32) {
    %c0_i32 = arith.constant 0 : i32
    %c0_i32_0 = arith.constant 0 : i32
    %c0_i32_1 = arith.constant 0 : i32
    return %c0_i32, %c0_i32_0 : i32, i32
  }
  func.func @transform_2(%arg0: i32) -> (i32, i32) {
    %c0_i32 = arith.constant 0 : i32
    %c0_i32_0 = arith.constant 0 : i32
    %c0_i32_1 = arith.constant 0 : i32
    return %c0_i32, %c0_i32_0 : i32, i32
  }
  func.func @transform_3(%arg0: i32) -> (i32, i32, i32) {
    %c0_i32 = arith.constant 0 : i32
    %c0_i32_0 = arith.constant 0 : i32
    %c0_i32_1 = arith.constant 0 : i32
    %c0_i32_2 = arith.constant 0 : i32
    return %c0_i32, %c0_i32_0, %c0_i32_1 : i32, i32, i32
  }
  func.func @transform_4(%arg0: i32) -> (i32, i32) {
    %c0_i32 = arith.constant 0 : i32
    %c0_i32_0 = arith.constant 0 : i32
    return %arg0, %c0_i32 : i32, i32
  }
}

</mosaic_0001>

<bundles_post_ra>
// kernel: tpu_custom_call.1
= control target key start
LH: loop header
LB: loop body
LE: loop exit
PB: predicated region body
PF: predicated region fallthrough
CT: control target
= control target key end

     0   :  { %9 = vsyncpa [#allocation3], 0  ;;  %s931_s0 = inlined_call_operand.vmem [shape: f32[32,12], index: 0, kind: input, shape index: {}]   ;;  %s932_s1 = inlined_call_operand.vmem [shape: f32[12,128], index: 1, kind: input, shape index: {}]   ;;  %s933_s2 = inlined_call_operand.vmem [shape: f32[1,128], index: 2, kind: input, shape index: {}]   ;;  %s934_s3 = inlined_call_operand.hbm [shape: f32[3,128,128], index: 3, kind: input, shape index: {}]   ;;  %s935_s4 = inlined_call_operand.hbm [shape: f32[32,128], index: 4, kind: output, shape index: {}]  }
   0x1   :  { %10 = vsyncpa [#allocation4], 0  ;;  %s836_s15 = smov [#allocation2]  }
   0x2   :  { %s22_s16 = sshll.u32 %s836_s15, 4  ;;  %s23_s16 = int_to_ptr.vmem [resolvable:$true] %s22_s16 }
   0x3   :  { %s800_s17 = scalar_lea.vmem %s23_s16, 6144  ;;  %p805_p1 = scmp.lt.s32.totalorder %s23_s16, %s23_s16 }
   0x4   :  { %p801_p0 = scmp.ne.s32.totalorder %s23_s16, %s800_s17  ;;  %p806_p2 = scmp.lt.s32.totalorder %s800_s17, %s800_s17 }
   0x6   :  { %p807_p3 = por %p806_p2, %p805_p1 }
   0x8   :  { %p808_p4 = pnand %p807_p3, %p801_p0 }
   0xa   :  { %811 = shalt.err (!%p808_p4)
}
   0xb   :  { %s837_s18 = smov 128   ;;  %s838_s19 = smov 8  }
   0xc   :  { %28 = dma.hbm_to_vmem [thread:$0]  %s934_s3, 6144, %s23_s16, [#allocation3], %s837_s18, %s837_s18, %s838_s19  }
   0xd   :  { %832 = dma.done.wait [#allocation3], 6144  }
   0xe   :  { %833 = vsyncadd [#allocation3], 4294961152  ;;  %vm111_vm0 = vcmask 1043456   ;;  %vm98_vm1 = vcmask 97280   ;;  %v90_v0 = vld [vmem:[%s932_s1 + $0x8] sm:$0xf]  ;;  %v32_v39 = vlaneseq }
   0xf   :  { %v89_v1 = vld [vmem:[%s932_s1] sm:$0xff]  ;;  %664 = vmatprep.subr.msk.mxu0 %vm111_vm0, %v90_v0  ;;  %v86_v3 = vld [vmem:[%s931_s0 + $0x8] sm:$0xff]  ;;  %v286_v4 = vld [vmem:[#allocation2 + $0xf8] sm:$0xff] }
  0x10   :  { %v85_v2 = vld [vmem:[%s931_s0] sm:$0xff]  ;;  %665 = vmatpush3.msk.msra.mxu0 %vm111_vm0, %v90_v0  ;;  %v244_v5 = vld [vmem:[#allocation2 + $0x78] sm:$0xff]  ;;  %v87_v6 = vld [vmem:[%s931_s0 + $0x10] sm:$0xff]  ;;  %674 = vmatprep.subr.mxu1 %v286_v4  ;;  %v33_v40 = vshrl.u32 %v32_v39, 7 }
  0x11   :  { %668 = vmatprep.mubr.msk.f32.mxu0 %vm98_vm1, %v85_v2  ;;  %666 = vmatprep.subr.mxu0 %v89_v1  ;;  %v285_v7 = vld [vmem:[#allocation2 + $0xf0] sm:$0xff]  ;;  %v284_v9 = vld [vmem:[#allocation2 + $0xe8] sm:$0xff]  ;;  %v88_v10 = vld [vmem:[%s931_s0 + $0x18] sm:$0xff] }
  0x12   :  { %667 = vmatpush3.msra.mxu0 %v89_v1  ;;  %675 = vmatpush3.msra.mxu1 %v286_v4  ;;  %v243_v8 = vld [vmem:[#allocation2 + $0x70] sm:$0xff]  ;;  %v283_v11 = vld [vmem:[#allocation2 + $0xe0] sm:$0xff]  ;;  %v242_v12 = vld [vmem:[#allocation2 + $0x68] sm:$0xff]  ;;  %v35_v45 = vadd.s32 16, %v33_v40  ;;  %v41_v48 = vand.u32 15, %v33_v40  ;;  %vm249_vm2 = vcmp.lt.s32.totalorder %v33_v40, 2 }
  0x13   :  { %669 = vmatmul.mubr.msk.f32.vlgmr.msra.gmra.mxu0 %vm98_vm1, %v86_v3  ;;  %712 = vmatprep.subr.mxu0 %v244_v5  ;;  %v282_v13 = vld [vmem:[#allocation2 + $0xd8] sm:$0xff]  ;;  %v241_v14 = vld [vmem:[#allocation2 + $0x60] sm:$0xff]  ;;  %v281_v15 = vld [vmem:[#allocation2 + $0xd0] sm:$0xff]  ;;  %vm208_vm4 = vcmp.lt.s32.totalorder %v33_v40, 4 }
  0x14   :  { %671 = vmatprep.mubr.msk.f32.mxu0 %vm98_vm1, %v87_v6  ;;  %676 = vmatprep.subr.mxu1 %v285_v7  ;;  %v240_v16 = vld [vmem:[#allocation2 + $0x58] sm:$0xff]  ;;  %v280_v17 = vld [vmem:[#allocation2 + $0xc8] sm:$0xff]  ;;  %v239_v18 = vld [vmem:[#allocation2 + $0x50] sm:$0xff]  ;;  %v55_v53 = vand.u32 15, %v35_v45  ;;  %vm254_vm3 = vcmp.ge.s32.totalorder %v41_v48, 2  ;;  %vm213_vm5 = vcmp.ge.s32.totalorder %v41_v48, 4 }
  0x15   :  { %713 = vmatpush3.msra.mxu0 %v244_v5  ;;  %677 = vmatpush3.msra.mxu1 %v285_v7  ;;  %v279_v19 = vld [vmem:[#allocation2 + $0xc0] sm:$0xff]  ;;  %v238_v20 = vld [vmem:[#allocation2 + $0x48] sm:$0xff]  ;;  %v278_v21 = vld [vmem:[#allocation2 + $0xb8] sm:$0xff] }
  0x16   :  { %714 = vmatprep.subr.mxu0 %v243_v8  ;;  %678 = vmatprep.subr.mxu1 %v284_v9  ;;  %v237_v22 = vld [vmem:[#allocation2 + $0x40] sm:$0xff]  ;;  %v277_v23 = vld [vmem:[#allocation2 + $0xb0] sm:$0xff]  ;;  %v236_v24 = vld [vmem:[#allocation2 + $0x38] sm:$0xff]  ;;  %vm906_vm6 = vcmp.ge.s32.totalorder %v55_v53, 2  ;;  %vm215_vm7 = vcmp.ge.s32.totalorder %v55_v53, 4 }
  0x17   :  { %672 = vmatmul.mubr.msk.f32.gmra.mxu0 %vm98_vm1, %v88_v10  ;;  %679 = vmatpush3.msra.mxu1 %v284_v9  ;;  %v235_v25 = vld [vmem:[#allocation2 + $0x30] sm:$0xff]  ;;  %v276_v26 = vld [vmem:[#allocation2 + $0xa8] sm:$0xff]  ;;  %v275_v28 = vld [vmem:[#allocation2 + $0xa0] sm:$0xff] }
  0x18   :  { %715 = vmatpush3.msra.mxu0 %v243_v8  ;;  %680 = vmatprep.subr.mxu1 %v283_v11  ;;  %v234_v27 = vld [vmem:[#allocation2 + $0x28] sm:$0xff]  ;;  %v233_v29 = vld [vmem:[#allocation2 + $0x20] sm:$0xff]  ;;  %v274_v30 = vld [vmem:[#allocation2 + $0x98] sm:$0xff] }
  0x19   :  { %716 = vmatprep.subr.mxu0 %v242_v12  ;;  %681 = vmatpush3.msra.mxu1 %v283_v11  ;;  %v232_v31 = vld [vmem:[#allocation2 + $0x18] sm:$0xff]  ;;  %v273_v32 = vld [vmem:[#allocation2 + $0x90] sm:$0xff]  ;;  %v272_v34 = vld [vmem:[#allocation2 + $0x88] sm:$0xff] }
  0x1a   :  { %717 = vmatpush3.msra.mxu0 %v242_v12  ;;  %682 = vmatprep.subr.mxu1 %v282_v13  ;;  %v231_v33 = vld [vmem:[#allocation2 + $0x10] sm:$0xff]  ;;  %v230_v35 = vld [vmem:[#allocation2 + $0x8] sm:$0xff]  ;;  %v271_v36 = vld [vmem:[#allocation2 + $0x80] sm:$0xff] }
  0x1b   :  { %718 = vmatprep.subr.mxu0 %v241_v14  ;;  %683 = vmatpush3.msra.mxu1 %v282_v13  ;;  %v229_v37 = vld [vmem:[#allocation2] sm:$0xff]  ;;  %v473_v38 = vld [vmem:[#allocation2 + $0x178] sm:$0xff]  ;;  %v472_v6 = vld [vmem:[#allocation2 + $0x170] sm:$0xff] }
  0x1c   :  { %719 = vmatpush3.msra.mxu0 %v241_v14  ;;  %684 = vmatprep.subr.mxu1 %v281_v15  ;;  %v588_v41 = vld [vmem:[%s933_s2] ss:$0 sm:$0xff]  ;;  %v471_v9 = vld [vmem:[#allocation2 + $0x168] sm:$0xff]  ;;  %v469_v13 = vld [vmem:[#allocation2 + $0x158] sm:$0xff]  ;;  %s839_s2 = smov [#allocation5]  }
  0x1d   :  { %720 = vmatprep.subr.mxu0 %v240_v16  ;;  %685 = vmatpush3.msra.mxu1 %v281_v15  ;;  %v470_v11 = vld [vmem:[#allocation2 + $0x160] sm:$0xff]  ;;  %v468_v14 = vld [vmem:[#allocation2 + $0x150] sm:$0xff]  ;;  %v467_v15 = vld [vmem:[#allocation2 + $0x148] sm:$0xff]  ;;  %s576_s7 = sshll.u32 %s839_s2, 4  ;;  %s577_s7 = int_to_ptr.vmem [resolvable:$true] %s576_s7 }
  0x1e   :  { %721 = vmatpush3.msra.mxu0 %v240_v16  ;;  %686 = vmatprep.subr.mxu1 %v280_v17  ;;  %v466_v16 = vld [vmem:[#allocation2 + $0x140] sm:$0xff]  ;;  %s812_s8 = scalar_lea.vmem %s577_s7, 512  ;;  %p817_p6 = scmp.lt.s32.totalorder %s577_s7, %s577_s7 }
  0x1f   :  { %722 = vmatprep.subr.mxu0 %v239_v18  ;;  %687 = vmatpush3.msra.mxu1 %v280_v17  ;;  %v465_v17 = vld [vmem:[#allocation2 + $0x138] sm:$0xff]  ;;  %p813_p5 = scmp.ne.s32.totalorder %s577_s7, %s812_s8  ;;  %p818_p7 = scmp.lt.s32.totalorder %s812_s8, %s812_s8 }
  0x20   :  { %723 = vmatpush3.msra.mxu0 %v239_v18  ;;  %688 = vmatprep.subr.mxu1 %v279_v19  ;;  %v464_v18 = vld [vmem:[#allocation2 + $0x130] sm:$0xff] }
  0x21   :  { %724 = vmatprep.subr.mxu0 %v238_v20  ;;  %689 = vmatpush3.msra.mxu1 %v279_v19  ;;  %v463_v19 = vld [vmem:[#allocation2 + $0x128] sm:$0xff]  ;;  %p819_p8 = por %p818_p7, %p817_p6 }
  0x22   :  { %725 = vmatpush3.msra.mxu0 %v238_v20  ;;  %690 = vmatprep.subr.mxu1 %v278_v21  ;;  %v462_v20 = vld [vmem:[#allocation2 + $0x120] sm:$0xff] }
  0x23   :  { %726 = vmatprep.subr.mxu0 %v237_v22  ;;  %691 = vmatpush3.msra.mxu1 %v278_v21  ;;  %v461_v21 = vld [vmem:[#allocation2 + $0x118] sm:$0xff]  ;;  %p820_p9 = pnand %p819_p8, %p813_p5 }
  0x24   :  { %727 = vmatpush3.msra.mxu0 %v237_v22  ;;  %692 = vmatprep.subr.mxu1 %v277_v23  ;;  %v460_v22 = vld [vmem:[#allocation2 + $0x110] sm:$0xff] }
  0x25   :  { %728 = vmatprep.subr.mxu0 %v236_v24  ;;  %693 = vmatpush3.msra.mxu1 %v277_v23  ;;  %v459_v23 = vld [vmem:[#allocation2 + $0x108] sm:$0xff] }
  0x26   :  { %729 = vmatpush3.msra.mxu0 %v236_v24  ;;  %694 = vmatprep.subr.mxu1 %v276_v26  ;;  %v458_v24 = vld [vmem:[#allocation2 + $0x100] sm:$0xff] }
  0x27   :  { %730 = vmatprep.subr.mxu0 %v235_v25  ;;  %695 = vmatpush3.msra.mxu1 %v276_v26 }
  0x28   :  { %731 = vmatpush3.msra.mxu0 %v235_v25  ;;  %696 = vmatprep.subr.mxu1 %v275_v28 }
  0x29   :  { %732 = vmatprep.subr.mxu0 %v234_v27  ;;  %697 = vmatpush3.msra.mxu1 %v275_v28 }
  0x2a   :  { %733 = vmatpush3.msra.mxu0 %v234_v27  ;;  %698 = vmatprep.subr.mxu1 %v274_v30 }
  0x2b   :  { %734 = vmatprep.subr.mxu0 %v233_v29  ;;  %699 = vmatpush3.msra.mxu1 %v274_v30 }
  0x2c   :  { %735 = vmatpush3.msra.mxu0 %v233_v29  ;;  %700 = vmatprep.subr.mxu1 %v273_v32 }
  0x2d   :  { %736 = vmatprep.subr.mxu0 %v232_v31  ;;  %701 = vmatpush3.msra.mxu1 %v273_v32 }
  0x2e   :  { %737 = vmatpush3.msra.mxu0 %v232_v31  ;;  %702 = vmatprep.subr.mxu1 %v272_v34 }
  0x2f   :  { %738 = vmatprep.subr.mxu0 %v231_v33  ;;  %703 = vmatpush3.msra.mxu1 %v272_v34 }
  0x30   :  { %739 = vmatpush3.msra.mxu0 %v231_v33  ;;  %704 = vmatprep.subr.mxu1 %v271_v36 }
  0x31   :  { %740 = vmatprep.subr.mxu0 %v230_v35  ;;  %705 = vmatpush3.msra.mxu1 %v271_v36 }
  0x32   :  { %741 = vmatpush3.msra.mxu0 %v230_v35  ;;  %750 = vmatprep.subr.mxu1 %v473_v38 }
  0x33   :  { %742 = vmatprep.subr.mxu0 %v229_v37 }
  0x34   :  { %743 = vmatpush3.msra.mxu0 %v229_v37 }
  0xd3   :  { %v670_v42 = vpop.f32.mrf.mxu0 }
  0xd4   :  { %v187_v43 = vadd.f32 %v670_v42, %v588_v41 }
  0xd5   :  { %v181_v44 = vpop.f32.mrf.mxu0 }
  0xd6   :  { %v182_v46 = vadd.f32 %v588_v41, %v181_v44  ;;  %v896_v51 = vmax.f32 %v187_v43, 0.0 }
  0xd7   :  { %v673_v47 = vpop.f32.mrf.mxu0 }
  0xd8   :  { %v200_v49 = vmax.f32 %v182_v46, 0.0  ;;  %v197_v50 = vadd.f32 %v673_v47, %v588_v41  ;;  %v205_v61 = vrot.slane %v896_v51, 4  ;;  %v246_v62 = vrot.slane %v896_v51, 6 }
  0xd9   :  { %v191_v52 = vpop.f32.mrf.mxu0 }
  0xda   :  { %v898_v54 = vmax.f32 %v197_v50, 0.0  ;;  %v192_v55 = vadd.f32 %v588_v41, %v191_v52  ;;  %v204_v56 = vrot.slane %v200_v49, 4  ;;  %v245_v57 = vrot.slane %v200_v49, 6 }
  0xdc   :  { %v207_v58 = vrot.slane %v898_v54, 4  ;;  %v901_v59 = vmax.f32 %v192_v55, 0.0  ;;  %v248_v60 = vrot.slane %v898_v54, 6  ;;  %v252_v4 = vsel %vm249_vm2, %v245_v57, %v246_v62 }
  0xdd   :  { %v211_v5 = vsel %vm208_vm4, %v204_v56, %v205_v61 }
  0xde   :  { %v206_v0 = vrot.slane %v901_v59, 4  ;;  %v247_v1 = vrot.slane %v901_v59, 6  ;;  %v253_v2 = vsel %vm249_vm2, %v248_v60, %v245_v57  ;;  %v212_v3 = vsel %vm208_vm4, %v207_v58, %v204_v56 }
  0xdf   :  { %706 = vmatprep.mubr.msk.f32.mxu1 %vm254_vm3, %v253_v2  ;;  %744 = vmatprep.mubr.msk.f32.mxu0 %vm213_vm5, %v212_v3 }
  0xe0   :  { %707 = vmatmul.mubr.f32.vlgmr.msra.gmra.mxu1 %v252_v4  ;;  %745 = vmatmul.mubr.f32.vlgmr.msra.gmra.mxu0 %v211_v5  ;;  %v251_v7 = vsel %vm249_vm2, %v246_v62, %v247_v1  ;;  %v210_v8 = vsel %vm208_vm4, %v205_v61, %v206_v0  ;;  %v250_v10 = vsel %vm249_vm2, %v247_v1, %v248_v60 }
  0xe1   :  { %751 = vmatpush3.msra.mxu1 %v473_v38  ;;  %709 = vmatprep.mubr.msk.f32.mxu1 %vm906_vm6, %v251_v7  ;;  %v209_v12 = vsel %vm208_vm4, %v206_v0, %v207_v58 }
  0xe2   :  { %747 = vmatprep.mubr.msk.f32.mxu0 %vm215_vm7, %v210_v8  ;;  %752 = vmatprep.subr.mxu1 %v472_v6 }
  0xe3   :  { %753 = vmatpush3.msra.mxu1 %v472_v6 }
  0xe4   :  { %754 = vmatprep.subr.mxu1 %v471_v9  ;;  %710 = vmatmul.mubr.f32.gmra.mxu1 %v250_v10 }
  0xe5   :  { %748 = vmatmul.mubr.f32.gmra.mxu0 %v209_v12  ;;  %755 = vmatpush3.msra.mxu1 %v471_v9 }
  0xe6   :  { %756 = vmatprep.subr.mxu1 %v470_v11  ;;  %782 = vmatprep.mubr.f32.mxu1 %v200_v49 }
  0xe7   :  { %757 = vmatpush3.msra.mxu1 %v470_v11 }
  0xe8   :  { %758 = vmatprep.subr.mxu1 %v469_v13 }
  0xe9   :  { %759 = vmatpush3.msra.mxu1 %v469_v13 }
  0xea   :  { %760 = vmatprep.subr.mxu1 %v468_v14 }
  0xeb   :  { %761 = vmatpush3.msra.mxu1 %v468_v14 }
  0xec   :  { %762 = vmatprep.subr.mxu1 %v467_v15 }
  0xed   :  { %763 = vmatpush3.msra.mxu1 %v467_v15 }
  0xee   :  { %764 = vmatprep.subr.mxu1 %v466_v16 }
  0xef   :  { %765 = vmatpush3.msra.mxu1 %v466_v16 }
  0xf0   :  { %766 = vmatprep.subr.mxu1 %v465_v17 }
  0xf1   :  { %767 = vmatpush3.msra.mxu1 %v465_v17 }
  0xf2   :  { %768 = vmatprep.subr.mxu1 %v464_v18 }
  0xf3   :  { %769 = vmatpush3.msra.mxu1 %v464_v18 }
  0xf4   :  { %770 = vmatprep.subr.mxu1 %v463_v19 }
  0xf5   :  { %771 = vmatpush3.msra.mxu1 %v463_v19 }
  0xf6   :  { %772 = vmatprep.subr.mxu1 %v462_v20 }
  0xf7   :  { %773 = vmatpush3.msra.mxu1 %v462_v20 }
  0xf8   :  { %774 = vmatprep.subr.mxu1 %v461_v21 }
  0xf9   :  { %775 = vmatpush3.msra.mxu1 %v461_v21 }
  0xfa   :  { %776 = vmatprep.subr.mxu1 %v460_v22 }
  0xfb   :  { %777 = vmatpush3.msra.mxu1 %v460_v22 }
  0xfc   :  { %778 = vmatprep.subr.mxu1 %v459_v23 }
  0xfd   :  { %779 = vmatpush3.msra.mxu1 %v459_v23 }
  0xfe   :  { %780 = vmatprep.subr.mxu1 %v458_v24 }
  0xff   :  { %781 = vmatpush3.msra.mxu1 %v458_v24 }
 0x100   :  { %783 = vmatmul.mubr.f32.vlgmr.msra.gmra.mxu1 %v896_v51 }
 0x101   :  { %785 = vmatprep.mubr.f32.mxu1 %v901_v59 }
 0x104   :  { %786 = vmatmul.mubr.f32.gmra.mxu1 %v898_v54 }
 0x1a0   :  { %v708_v25 = vpop.f32.mrf.mxu1  ;;  %v746_v26 = vpop.f32.mrf.mxu0 }
 0x1a1   :  { %v444_v32 = vadd.f32 %v746_v26, %v708_v25 }
 0x1a2   :  { %v353_v27 = vpop.f32.mrf.mxu1  ;;  %v438_v28 = vpop.f32.mrf.mxu0 }
 0x1a3   :  { %v439_v34 = vadd.f32 %v438_v28, %v353_v27 }
 0x1a4   :  { %v711_v29 = vpop.f32.mrf.mxu1 }
 0x1a5   :  { %v749_v30 = vpop.f32.mrf.mxu0 }
 0x1a6   :  { %v363_v31 = vpop.f32.mrf.mxu1  ;;  %v454_v38 = vadd.f32 %v749_v30, %v711_v29 }
 0x1a7   :  { %v448_v36 = vpop.f32.mrf.mxu0 }
 0x1a8   :  { %v449_v42 = vadd.f32 %v448_v36, %v363_v31 }
 0x1c0   :  { %v784_v33 = vpop.f32.mrf.mxu1 }
 0x1c1   :  { %v560_v35 = vadd.f32 %v784_v33, %v444_v32 }
 0x1c2   :  { %v540_v37 = vpop.f32.mrf.mxu1 }
 0x1c3   :  { %v564_v39 = vmax.f32 %v560_v35, 0.0  ;;  %v559_v40 = vadd.f32 %v540_v37, %v439_v34 }
 0x1c4   :  { %v787_v41 = vpop.f32.mrf.mxu1 }
 0x1c5   :  { %568 = vst [vmem:[#allocation5 + $0x8] sm:$0xff] %v564_v39  ;;  %v563_v43 = vmax.f32 %v559_v40, 0.0  ;;  %v562_v44 = vadd.f32 %v787_v41, %v454_v38 }
 0x1c6   :  { %v550_v45 = vpop.f32.mrf.mxu1 }
 0x1c7   :  { %567 = vst [vmem:[#allocation5] sm:$0xff] %v563_v43  ;;  %v566_v46 = vmax.f32 %v562_v44, 0.0  ;;  %v561_v47 = vadd.f32 %v550_v45, %v449_v42 }
 0x1c9   :  { %570 = vst [vmem:[#allocation5 + $0x18] sm:$0xff] %v566_v46  ;;  %v565_v48 = vmax.f32 %v561_v47, 0.0 }
 0x1cb   :  { %569 = vst [vmem:[#allocation5 + $0x10] sm:$0xff] %v565_v48 }
 0x1cc   :  { %823 = shalt.err (!%p820_p9)
}
 0x1cd   :  { %582 = dma.vmem_to_hbm [thread:$0]  %s577_s7, 512, %s935_s4, [#allocation4], %s837_s18, %s837_s18, %s838_s19  }
 0x1ce   :  { %834 = dma.done.wait [#allocation4], 512  }
 0x1cf   :  { %835 = vsyncadd [#allocation4], 4294966784 }
 0x1d0   :  { %586 = vsyncpa [#allocation3], 1 }
 0x1d1   :  { %587 = vsyncpa [#allocation4], 1 }

</bundles_post_ra>
